<compile_context>
chip_gen: v7x
topology: tpu7x:2x2x1
jax: 0.10.0
libtpu: 0.0.40
codegen_flags: <defaults>
</compile_context>

<pallas_src>
import functools

import jax
import jax.numpy as jnp
from jax.experimental import pallas as pl
from jax.experimental.pallas import tpu as pltpu


def _cdiv(a, b):
    return -(-a // b)


def _round_up(x, m):
    return _cdiv(x, m) * m


def _pool_configs(sizes):
    """Distinct (kernel, stride, out_size) configs + per-size config index."""
    configs, idx = [], []
    for size in sizes:
        if 8 % size == 0:
            k = 8 // size
            s = k
        else:
            k, s = 4, 2
        o = (8 - k) // s + 1
        cfg = (k, s, o)
        if cfg not in configs:
            configs.append(cfg)
        idx.append(configs.index(cfg))
    return tuple(configs), tuple(idx)


def _spp_kernel(x_ref, o_ref, *, configs):
    """x_ref: (Bt, 8, 8, Ct) NHWC block; o_ref: (Bt, R, Ct) merged pooled rows.

    Row layout of o_ref (per batch element): for each distinct config in
    `configs` order, rows oi*o + oj hold the pooled cell (oi, oj); trailing
    rows (up to R, a multiple of 8) are zero padding.
    """
    bt = x_ref.shape[0]
    ct = x_ref.shape[3]
    r_total = o_ref.shape[1]

    for bi in range(bt):
        # ---- H pooling: elementwise max of row slabs (pure VPU, no relayout).
        rowp = {}

        def get_rowp(k, i0, bi=bi):
            key = (k, i0)
            if key not in rowp:
                h = k // 2
                if (h, i0) in rowp and (h, i0 + h) in rowp:
                    # k=8 window is the max of its two k=4 halves.
                    rowp[key] = jnp.maximum(rowp[(h, i0)], rowp[(h, i0 + h)])
                else:
                    m = x_ref[bi, i0]                      # (8, Ct): W x C
                    for d in range(1, k):
                        m = jnp.maximum(m, x_ref[bi, i0 + d])
                    rowp[key] = m
            return rowp[key]

        # ---- W pooling: short sublane reductions, deduped across configs.
        cells = {}
        for (k, s, o) in sorted(configs):                  # small k first
            for oi in range(o):
                m = get_rowp(k, oi * s)
                for oj in range(o):
                    key = (k, oi * s, oj * s)
                    if key not in cells:
                        cells[key] = jnp.max(m[oj * s:oj * s + k, :],
                                             axis=0, keepdims=True)  # (1, Ct)

        # ---- Assemble merged output rows in the declared layout order.
        rows = []
        for (k, s, o) in configs:
            for oi in range(o):
                for oj in range(o):
                    rows.append(cells[(k, oi * s, oj * s)])
        zero_row = jnp.zeros((1, ct), dtype=o_ref.dtype)
        rows += [zero_row] * (r_total - len(rows))

        # Store in full 8-sublane chunks (unmasked stores, bounded live set).
        for r0 in range(0, r_total, 8):
            o_ref[bi, r0:r0 + 8] = jnp.concatenate(rows[r0:r0 + 8], axis=0)


@functools.partial(jax.jit, static_argnames=("sizes",))
def spp_module_max(x_nchw, sizes=(1, 2, 3, 6)):
    """SPPModuleMax.forward.  x_nchw: (B, C, 8, 8) -> (B, sum C*o*o, 1, 1)."""
    B, C, H, W = x_nchw.shape
    if H != 8 or W != 8:
        # TODO(synk): the module hard-codes an 8x8 map (kernel_size = 8 // size);
        #             other spatial sizes are not modeled.
        raise ValueError("SPPModuleMax expects an 8x8 feature map")

    configs, cfg_idx = _pool_configs(sizes)
    row_off, off = [], 0
    for (_, _, o) in configs:
        row_off.append(off)
        off += o * o
    total_rows = off
    R = _round_up(total_rows, 8)                           # sublane-aligned rows

    # NCHW -> NHWC so channels land on the 128-lane axis.  The PyTorch contract
    # delivers NCHW, so this one XLA transpose pass is unavoidable here.
    x = jnp.transpose(x_nchw, (0, 2, 3, 1))                # (B, 8, 8, C)

    # Channel tiling: avoid an extra pad pass over x whenever possible.
    if C % 128 == 0:
        Cp, Ct = C, min(C, 512)
    elif C <= 1024:
        Cp, Ct = C, C                                      # full-extent lane block
    else:
        Cp = _round_up(C, 128)                             # rare: huge, awkward C
        x = jnp.pad(x, ((0, 0), (0, 0), (0, 0), (0, Cp - C)))
        Ct = 512
    n_c = _cdiv(Cp, Ct)

    # Batch blocking: target ~2 MiB of input per grid step, bounded unroll,
    # keep >=2 grid steps (when possible) so both v7x TensorCores are fed.
    itemsize = jnp.dtype(x.dtype).itemsize
    per_b = 8 * 8 * Ct * itemsize
    Bt = max(1, min(B, (2 << 20) // per_b, 16))
    if B > 1 and n_c * _cdiv(B, Bt) < 2:
        Bt = _cdiv(B, 2)
    n_b = _cdiv(B, Bt)

    out = pl.pallas_call(
        functools.partial(_spp_kernel, configs=configs),
        out_shape=jax.ShapeDtypeStruct((B, R, Cp), x.dtype),
        grid_spec=pltpu.PrefetchScalarGridSpec(
            num_scalar_prefetch=0,
            grid=(n_b, n_c),
            in_specs=[pl.BlockSpec((Bt, 8, 8, Ct), lambda b, c: (b, 0, 0, c))],
            out_specs=pl.BlockSpec((Bt, R, Ct), lambda b, c: (b, 0, c))),
        compiler_params=pltpu.CompilerParams(
            dimension_semantics=("parallel", "parallel")),
    )(x)

    # Epilogue: one transpose + static slices + one concatenate restores the
    # PyTorch Flatten (channel-major) + cat(dim=1) ordering.
    y = jnp.transpose(out[:, :total_rows, :C], (0, 2, 1))  # (B, C, total_rows)
    segs = []
    for si in range(len(sizes)):
        ci = cfg_idx[si]
        o = configs[ci][2]
        r0 = row_off[ci]
        segs.append(y[:, :, r0:r0 + o * o].reshape(B, C * o * o))
    yc = jnp.concatenate(segs, axis=1)
    return yc[:, :, None, None]


def _spp_reference(x_nchw, sizes=(1, 2, 3, 6)):
    """Pure-JAX reference mirroring the PyTorch module exactly."""
    B = x_nchw.shape[0]
    init = jnp.array(-jnp.inf, dtype=x_nchw.dtype)
    segs = []
    for size in sizes:
        if 8 % size == 0:
            k = 8 // size
            s = k
        else:
            k, s = 4, 2
        p = jax.lax.reduce_window(x_nchw, init, jax.lax.max,
                                  (1, 1, k, k), (1, 1, s, s), "VALID")
        segs.append(p.reshape(B, -1))
    return jnp.concatenate(segs, axis=1)[:, :, None, None]


if __name__ == "__main__":
    key = jax.random.PRNGKey(0)
    k1, k2 = jax.random.split(key)

    # (B, C, 8, 8): the module's pooling hard-codes an 8x8 spatial map.
    x1 = jax.random.normal(k1, (2, 128, 8, 8), jnp.float32)
    y1 = spp_module_max(x1)
    jax.block_until_ready(y1)
    assert y1.shape == (2, 128 * (1 + 4 + 9 + 9), 1, 1), y1.shape
    r1 = _spp_reference(x1)
    assert jnp.allclose(y1, r1), float(jnp.max(jnp.abs(y1 - r1)))

    # Non-128-multiple channels + odd batch: exercises the no-pad full-extent
    # lane block and a partial trailing batch block.
    x2 = jax.random.normal(k2, (3, 96, 8, 8), jnp.float32)
    y2 = spp_module_max(x2)
    jax.block_until_ready(y2)
    assert y2.shape == (3, 96 * (1 + 4 + 9 + 9), 1, 1), y2.shape
    r2 = _spp_reference(x2)
    assert jnp.allclose(y2, r2), float(jnp.max(jnp.abs(y2 - r2)))

    print("KERNEL_OK")
</pallas_src>

<mosaic_0001>
module attributes {stable_mosaic.version = 11 : i64} {
  func.func @_spp_kernel(%arg0: i32, %arg1: i32, %arg2: memref<1x8x8x128xf32, #tpu.memory_space<vmem>>, %arg3: memref<1x16x128xf32, #tpu.memory_space<vmem>>) attributes {dimension_semantics = [#tpu.dimension_semantics<parallel>, #tpu.dimension_semantics<parallel>], iteration_bounds = array<i64: 2, 1>, scalar_prefetch = 0 : i64, scratch_operands = 0 : i64, tpu.core_type = #tpu.core_type<tc>, window_params = [{transform_indices = @transform_0, window_bounds = array<i64: 1, 8, 8, 128>}, {transform_indices = @transform_1, window_bounds = array<i64: 1, 16, 128>}]} {
    %c0 = arith.constant 0 : index
    %c0_0 = arith.constant 0 : index
    %c0_1 = arith.constant 0 : index
    %c0_2 = arith.constant 0 : index
    %0 = vector.load %arg2[%c0, %c0_0, %c0_1, %c0_2] : memref<1x8x8x128xf32, #tpu.memory_space<vmem>>, vector<1x1x8x128xf32>
    %1 = vector.shape_cast %0 : vector<1x1x8x128xf32> to vector<8x128xf32>
    %c0_3 = arith.constant 0 : index
    %c1 = arith.constant 1 : index
    %c0_4 = arith.constant 0 : index
    %c0_5 = arith.constant 0 : index
    %2 = vector.load %arg2[%c0_3, %c1, %c0_4, %c0_5] : memref<1x8x8x128xf32, #tpu.memory_space<vmem>>, vector<1x1x8x128xf32>
    %3 = vector.shape_cast %2 : vector<1x1x8x128xf32> to vector<8x128xf32>
    %4 = arith.maximumf %1, %3 : vector<8x128xf32>
    %c0_6 = arith.constant 0 : index
    %c2 = arith.constant 2 : index
    %c0_7 = arith.constant 0 : index
    %c0_8 = arith.constant 0 : index
    %5 = vector.load %arg2[%c0_6, %c2, %c0_7, %c0_8] : memref<1x8x8x128xf32, #tpu.memory_space<vmem>>, vector<1x1x8x128xf32>
    %6 = vector.shape_cast %5 : vector<1x1x8x128xf32> to vector<8x128xf32>
    %7 = arith.maximumf %4, %6 : vector<8x128xf32>
    %c0_9 = arith.constant 0 : index
    %c3 = arith.constant 3 : index
    %c0_10 = arith.constant 0 : index
    %c0_11 = arith.constant 0 : index
    %8 = vector.load %arg2[%c0_9, %c3, %c0_10, %c0_11] : memref<1x8x8x128xf32, #tpu.memory_space<vmem>>, vector<1x1x8x128xf32>
    %9 = vector.shape_cast %8 : vector<1x1x8x128xf32> to vector<8x128xf32>
    %10 = arith.maximumf %7, %9 : vector<8x128xf32>
    %11 = vector.extract_strided_slice %10 {offsets = [0, 0], sizes = [4, 128], strides = [1, 1]} : vector<8x128xf32> to vector<4x128xf32>
    %cst = arith.constant dense<0xFF800000> : vector<128xf32>
    %12 = vector.multi_reduction <maximumf>, %11, %cst [0] : vector<4x128xf32> to vector<128xf32>
    %13 = vector.shape_cast %12 : vector<128xf32> to vector<1x128xf32>
    %14 = vector.extract_strided_slice %10 {offsets = [2, 0], sizes = [4, 128], strides = [1, 1]} : vector<8x128xf32> to vector<4x128xf32>
    %cst_12 = arith.constant dense<0xFF800000> : vector<128xf32>
    %15 = vector.multi_reduction <maximumf>, %14, %cst_12 [0] : vector<4x128xf32> to vector<128xf32>
    %16 = vector.shape_cast %15 : vector<128xf32> to vector<1x128xf32>
    %17 = vector.extract_strided_slice %10 {offsets = [4, 0], sizes = [4, 128], strides = [1, 1]} : vector<8x128xf32> to vector<4x128xf32>
    %cst_13 = arith.constant dense<0xFF800000> : vector<128xf32>
    %18 = vector.multi_reduction <maximumf>, %17, %cst_13 [0] : vector<4x128xf32> to vector<128xf32>
    %19 = vector.shape_cast %18 : vector<128xf32> to vector<1x128xf32>
    %c0_14 = arith.constant 0 : index
    %c2_15 = arith.constant 2 : index
    %c0_16 = arith.constant 0 : index
    %c0_17 = arith.constant 0 : index
    %20 = vector.load %arg2[%c0_14, %c2_15, %c0_16, %c0_17] : memref<1x8x8x128xf32, #tpu.memory_space<vmem>>, vector<1x1x8x128xf32>
    %21 = vector.shape_cast %20 : vector<1x1x8x128xf32> to vector<8x128xf32>
    %c0_18 = arith.constant 0 : index
    %c3_19 = arith.constant 3 : index
    %c0_20 = arith.constant 0 : index
    %c0_21 = arith.constant 0 : index
    %22 = vector.load %arg2[%c0_18, %c3_19, %c0_20, %c0_21] : memref<1x8x8x128xf32, #tpu.memory_space<vmem>>, vector<1x1x8x128xf32>
    %23 = vector.shape_cast %22 : vector<1x1x8x128xf32> to vector<8x128xf32>
    %24 = arith.maximumf %21, %23 : vector<8x128xf32>
    %c0_22 = arith.constant 0 : index
    %c4 = arith.constant 4 : index
    %c0_23 = arith.constant 0 : index
    %c0_24 = arith.constant 0 : index
    %25 = vector.load %arg2[%c0_22, %c4, %c0_23, %c0_24] : memref<1x8x8x128xf32, #tpu.memory_space<vmem>>, vector<1x1x8x128xf32>
    %26 = vector.shape_cast %25 : vector<1x1x8x128xf32> to vector<8x128xf32>
    %27 = arith.maximumf %24, %26 : vector<8x128xf32>
    %c0_25 = arith.constant 0 : index
    %c5 = arith.constant 5 : index
    %c0_26 = arith.constant 0 : index
    %c0_27 = arith.constant 0 : index
    %28 = vector.load %arg2[%c0_25, %c5, %c0_26, %c0_27] : memref<1x8x8x128xf32, #tpu.memory_space<vmem>>, vector<1x1x8x128xf32>
    %29 = vector.shape_cast %28 : vector<1x1x8x128xf32> to vector<8x128xf32>
    %30 = arith.maximumf %27, %29 : vector<8x128xf32>
    %31 = vector.extract_strided_slice %30 {offsets = [0, 0], sizes = [4, 128], strides = [1, 1]} : vector<8x128xf32> to vector<4x128xf32>
    %cst_28 = arith.constant dense<0xFF800000> : vector<128xf32>
    %32 = vector.multi_reduction <maximumf>, %31, %cst_28 [0] : vector<4x128xf32> to vector<128xf32>
    %33 = vector.shape_cast %32 : vector<128xf32> to vector<1x128xf32>
    %34 = vector.extract_strided_slice %30 {offsets = [2, 0], sizes = [4, 128], strides = [1, 1]} : vector<8x128xf32> to vector<4x128xf32>
    %cst_29 = arith.constant dense<0xFF800000> : vector<128xf32>
    %35 = vector.multi_reduction <maximumf>, %34, %cst_29 [0] : vector<4x128xf32> to vector<128xf32>
    %36 = vector.shape_cast %35 : vector<128xf32> to vector<1x128xf32>
    %37 = vector.extract_strided_slice %30 {offsets = [4, 0], sizes = [4, 128], strides = [1, 1]} : vector<8x128xf32> to vector<4x128xf32>
    %cst_30 = arith.constant dense<0xFF800000> : vector<128xf32>
    %38 = vector.multi_reduction <maximumf>, %37, %cst_30 [0] : vector<4x128xf32> to vector<128xf32>
    %39 = vector.shape_cast %38 : vector<128xf32> to vector<1x128xf32>
    %c0_31 = arith.constant 0 : index
    %c4_32 = arith.constant 4 : index
    %c0_33 = arith.constant 0 : index
    %c0_34 = arith.constant 0 : index
    %40 = vector.load %arg2[%c0_31, %c4_32, %c0_33, %c0_34] : memref<1x8x8x128xf32, #tpu.memory_space<vmem>>, vector<1x1x8x128xf32>
    %41 = vector.shape_cast %40 : vector<1x1x8x128xf32> to vector<8x128xf32>
    %c0_35 = arith.constant 0 : index
    %c5_36 = arith.constant 5 : index
    %c0_37 = arith.constant 0 : index
    %c0_38 = arith.constant 0 : index
    %42 = vector.load %arg2[%c0_35, %c5_36, %c0_37, %c0_38] : memref<1x8x8x128xf32, #tpu.memory_space<vmem>>, vector<1x1x8x128xf32>
    %43 = vector.shape_cast %42 : vector<1x1x8x128xf32> to vector<8x128xf32>
    %44 = arith.maximumf %41, %43 : vector<8x128xf32>
    %c0_39 = arith.constant 0 : index
    %c6 = arith.constant 6 : index
    %c0_40 = arith.constant 0 : index
    %c0_41 = arith.constant 0 : index
    %45 = vector.load %arg2[%c0_39, %c6, %c0_40, %c0_41] : memref<1x8x8x128xf32, #tpu.memory_space<vmem>>, vector<1x1x8x128xf32>
    %46 = vector.shape_cast %45 : vector<1x1x8x128xf32> to vector<8x128xf32>
    %47 = arith.maximumf %44, %46 : vector<8x128xf32>
    %c0_42 = arith.constant 0 : index
    %c7 = arith.constant 7 : index
    %c0_43 = arith.constant 0 : index
    %c0_44 = arith.constant 0 : index
    %48 = vector.load %arg2[%c0_42, %c7, %c0_43, %c0_44] : memref<1x8x8x128xf32, #tpu.memory_space<vmem>>, vector<1x1x8x128xf32>
    %49 = vector.shape_cast %48 : vector<1x1x8x128xf32> to vector<8x128xf32>
    %50 = arith.maximumf %47, %49 : vector<8x128xf32>
    %51 = vector.extract_strided_slice %50 {offsets = [0, 0], sizes = [4, 128], strides = [1, 1]} : vector<8x128xf32> to vector<4x128xf32>
    %cst_45 = arith.constant dense<0xFF800000> : vector<128xf32>
    %52 = vector.multi_reduction <maximumf>, %51, %cst_45 [0] : vector<4x128xf32> to vector<128xf32>
    %53 = vector.shape_cast %52 : vector<128xf32> to vector<1x128xf32>
    %54 = vector.extract_strided_slice %50 {offsets = [2, 0], sizes = [4, 128], strides = [1, 1]} : vector<8x128xf32> to vector<4x128xf32>
    %cst_46 = arith.constant dense<0xFF800000> : vector<128xf32>
    %55 = vector.multi_reduction <maximumf>, %54, %cst_46 [0] : vector<4x128xf32> to vector<128xf32>
    %56 = vector.shape_cast %55 : vector<128xf32> to vector<1x128xf32>
    %57 = vector.extract_strided_slice %50 {offsets = [4, 0], sizes = [4, 128], strides = [1, 1]} : vector<8x128xf32> to vector<4x128xf32>
    %cst_47 = arith.constant dense<0xFF800000> : vector<128xf32>
    %58 = vector.multi_reduction <maximumf>, %57, %cst_47 [0] : vector<4x128xf32> to vector<128xf32>
    %59 = vector.shape_cast %58 : vector<128xf32> to vector<1x128xf32>
    %60 = arith.maximumf %10, %50 : vector<8x128xf32>
    %cst_48 = arith.constant dense<0xFF800000> : vector<128xf32>
    %61 = vector.multi_reduction <maximumf>, %60, %cst_48 [0] : vector<8x128xf32> to vector<128xf32>
    %62 = vector.shape_cast %61 : vector<128xf32> to vector<1x128xf32>
    %cst_49 = arith.constant 0.000000e+00 : f32
    %63 = vector.broadcast %cst_49 : f32 to vector<1x128xf32>
    %64 = tpu.concatenate %62, %13, %19, %53, %59, %13, %16, %19 in 0 : vector<1x128xf32>, vector<1x128xf32>, vector<1x128xf32>, vector<1x128xf32>, vector<1x128xf32>, vector<1x128xf32>, vector<1x128xf32>, vector<1x128xf32> -> vector<8x128xf32>
    %c0_50 = arith.constant 0 : index
    %c0_51 = arith.constant 0 : index
    %c0_52 = arith.constant 0 : index
    %65 = vector.load %arg3[%c0_50, %c0_51, %c0_52] : memref<1x16x128xf32, #tpu.memory_space<vmem>>, vector<1x8x128xf32>
    %66 = vector.shape_cast %65 : vector<1x8x128xf32> to vector<8x128xf32>
    %67 = vector.shape_cast %64 : vector<8x128xf32> to vector<1x8x128xf32>
    tpu.vector_store %arg3[%c0_50, %c0_51, %c0_52], %67 {strides = array<i32>} : memref<1x16x128xf32, #tpu.memory_space<vmem>>, vector<1x8x128xf32>,
    %68 = tpu.concatenate %33, %36, %39, %53, %56, %59, %63, %63 in 0 : vector<1x128xf32>, vector<1x128xf32>, vector<1x128xf32>, vector<1x128xf32>, vector<1x128xf32>, vector<1x128xf32>, vector<1x128xf32>, vector<1x128xf32> -> vector<8x128xf32>
    %c0_53 = arith.constant 0 : index
    %c8 = arith.constant 8 : index
    %c0_54 = arith.constant 0 : index
    %69 = vector.load %arg3[%c0_53, %c8, %c0_54] : memref<1x16x128xf32, #tpu.memory_space<vmem>>, vector<1x8x128xf32>
    %70 = vector.shape_cast %69 : vector<1x8x128xf32> to vector<8x128xf32>
    %71 = vector.shape_cast %68 : vector<8x128xf32> to vector<1x8x128xf32>
    tpu.vector_store %arg3[%c0_53, %c8, %c0_54], %71 {strides = array<i32>} : memref<1x16x128xf32, #tpu.memory_space<vmem>>, vector<1x8x128xf32>,
    return
  }
  func.func @transform_0(%arg0: i32, %arg1: i32) -> (i32, i32, i32, i32) {
    %c0_i32 = arith.constant 0 : i32
    %c0_i32_0 = arith.constant 0 : i32
    %c0_i32_1 = arith.constant 0 : i32
    return %arg0, %c0_i32, %c0_i32_0, %arg1 : i32, i32, i32, i32
  }
  func.func @transform_1(%arg0: i32, %arg1: i32) -> (i32, i32, i32) {
    %c0_i32 = arith.constant 0 : i32
    %c0_i32_0 = arith.constant 0 : i32
    return %arg0, %c0_i32, %arg1 : i32, i32, i32
  }
}

</mosaic_0001>

<bundles_post_ra>
// kernel: spp_module_max.1
= control target key start
LH: loop header
LB: loop body
LE: loop exit
PB: predicated region body
PF: predicated region fallthrough
CT: control target
= control target key end

     0   :  { %6 = vsyncpa [#allocation3], 0  ;;  %s689_s0 = inlined_call_operand.hbm [shape: f32[2,8,8,128], index: 0, kind: input, shape index: {}]   ;;  %s690_s1 = inlined_call_operand.vmem [shape: f32[2,16,128], index: 1, kind: output, shape index: {}]  }
   0x1   :  { %8 = vsyncpa [#allocation3 + $0x1], 0  ;;  %s544_s6 = smov 0   ;;  %s546_s7 = smov 0  }
   0x2   :  { %s548_s8 = smov 0   ;;  %s550_s9 = smov 0  }
   0x3   :  { %s552_s10 = smov 0   ;;  %s554_s11 = smov 0  }
   0x4 LB: > { %s370_s12 = sadd.s32 4294967295, %s529_s11   ;;  %s26_s13 = sadd.s32 1, %s525_s10  ;;  %s529_s11 = sphi %s554_s11, %s14_s11   ;;  %s525_s10 = sphi %s552_s10, %s698_s10   ;;  %s521_s9 = sphi %s550_s9, %s697_s9   ;;  %s517_s8 = sphi %s548_s8, %s696_s8   ;;  %s513_s7 = sphi %s546_s7, %s695_s7   ;;  %s509_s6 = sphi %s544_s6, %s694_s6  }
   0x5   : > { %p28_p0 = scmp.ge.s32.totalorder %s26_s13, 2  ;;  %s35_s14 = sadd.s32 1, %s517_s8 }
   0x6   : > { %p42_p1 = scmp.ne.s32.totalorder %s517_s8, %s513_s7  ;;  %p43_p2 = scmp.eq.s32.totalorder %s529_s11, 0 }
   0x7   : > { %s700_s13 = smov (%p28_p0, %s26_s13), 0  ;;  %p48_p4 = scmp.ne.s32.totalorder %s513_s7, %s509_s6 }
   0x8   : > { %p580_p3 = por %p43_p2, %p42_p1  ;;  %s30_s16 = ssub.s32 %s525_s10, %s700_s13 }
   0x9   : > { %p49_p5 = scmp.eq.s32.totalorder %s370_s12, 0  ;;  %p33_p6 = scmp.eq.s32.totalorder %s30_s16, 0 }
   0xa   : > { %p398_p8 = scmp.lt.s32.totalorder %s529_s11, 2  ;;  %s100_s19 = sand.u32 1, %s517_s8  }
   0xb   : > { %p587_p7 = por %p49_p5, %p48_p4  ;;  %s390_s20 = sshll.u32 %s525_s10, 10 }
   0xc   : > { %s593_s18 = scalar_select %p33_p6, %s517_s8, %s35_s14  }
   0xd   : > { %s374_s21 = sshll.u32 %s100_s19, 6  ;;  %s600_s24 = scalar_lea.hbm %s689_s0, %s390_s20 }
   0xe   : > { %s104_s25 = scalar_lea.vmem [#allocation2], %s374_s21  ;;  %p604_p9 = pnand %p398_p8, %p580_p3 }
   0xf   : > { %s112_s26 = sshll.u32 %s104_s25, 4  ;;  %s610_s28 = scalar_lea.sflag [#allocation3], %s100_s19  ;;  %s608_s26 = int_to_ptr.vmem [resolvable:$true] %s112_s26 }
  0x10   : > { %s449_s29 = scalar_lea.hbm %s600_s24, 1024  ;;  %p451_p11 = pneg %p604_p9 }
  0x11   : > { %p450_p10 = scmp.ne.s32.totalorder %s600_s24, %s449_s29  ;;  %s454_s3 = scalar_lea.hbm %s689_s0, 2048 }
  0x12   : > { %p455_p0 = scmp.lt.u32.totalorder %s600_s24, %s689_s0  ;;  %p456_p1 = scmp.lt.u32.totalorder %s454_s3, %s449_s29 }
  0x13   : > { %p452_p12 = pnand %p451_p11, %p450_p10  ;;  %p458_p3 = scmp.lt.u32.totalorder %s449_s29, %s600_s24 }
  0x14   : > { %p457_p2 = por %p456_p1, %p455_p0 }
  0x15   : > { %p453_p13 = pneg %p452_p12 }
  0x16   : > { %p459_p4 = por %p458_p3, %p457_p2 }
  0x18   : > { %p460_p5 = pnand %p459_p4, %p453_p13 }
  0x1a   : > { %463 = shalt.err (!%p460_p5)
}
  0x1b   : > { %s464_s6 = scalar_lea.vmem %s608_s26, 1024  ;;  %s531_s12 = smov [#allocation2]  }
  0x1c   : > { %p465_p6 = scmp.ne.s32.totalorder %s608_s26, %s464_s6  ;;  %s469_s14 = sshll.u32 %s531_s12, 4  ;;  %s470_s14 = int_to_ptr.vmem [resolvable:$false] %s469_s14 }
  0x1d   : > { %s471_s15 = scalar_lea.vmem %s470_s14, 2048  ;;  %p472_p12 = scmp.lt.s32.totalorder %s608_s26, %s470_s14 }
  0x1e   : > { %p467_p8 = pnand %p465_p6, %p451_p11  ;;  %p473_p0 = scmp.lt.s32.totalorder %s471_s15, %s464_s6 }
  0x20   : > { %p468_p10 = pneg %p467_p8  ;;  %p474_p1 = por %p473_p0, %p472_p12 }
  0x22   : > { %p475_p2 = pnand %p474_p1, %p468_p10 }
  0x24   : > { %478 = shalt.err (!%p475_p2)
}
  0x25   : > { %s532_s16 = smov 128   ;;  %s533_s19 = smov 8  }
  0x26   : > { %397 = dma.hbm_to_vmem [thread:$0]  (!%p604_p9), %s600_s24, 1024, %s608_s26, %s610_s28, %s532_s16, %s532_s16, %s533_s19  }
  0x27   : > { %p377_p11 = scmp.ge.s32.totalorder %s529_s11, 1  ;;  %p120_p13 = scmp.lt.s32.totalorder %s529_s11, 3 }
  0x29   : > { %p121_p3 = pnand %p377_p11, %p120_p13 }
  0x2a   : > { %s126_s20 = sand.u32 (!%p121_p3), 1, %s513_s7  }
  0x2b   : > { %124 = sbr.rel (%p121_p3) target bundleno = 89 (0x59), region = 24  ;;  %s378_s21 = sshll.u32 (!%p121_p3), %s126_s20, 6 }
  0x2c   : > { %s127_s22 = scalar_lea.sflag (!%p121_p3), [#allocation3], %s126_s20  ;;  %s130_s23 = scalar_lea.vmem (!%p121_p3), [#allocation2], %s378_s21 }
  0x32   : > { %504 = dma.done.wait (%p587_p7), %s127_s22, 1024  }
  0x33   : > { %506 = vsyncadd (%p587_p7), %s127_s22, 4294966272  ;;  %v160_v0 = vld [vmem:[%s130_s23] sm:$0xff]  ;;  %v381_v1 = vld [vmem:[%s130_s23 + $0x8] sm:$0xff]  ;;  %vm170_vm0 = vcmask 1043456   ;;  %vm186_vm1 = vcmask 1047556   ;;  %vm178_vm2 = vcmask 1045506  }
  0x34   : > { %v382_v2 = vld [vmem:[%s130_s23 + $0x10] sm:$0xff]  ;;  %v163_v3 = vmax.f32 %v160_v0, %v381_v1  ;;  %v383_v4 = vld [vmem:[%s130_s23 + $0x18] sm:$0xff]  ;;  %v384_v5 = vld [vmem:[%s130_s23 + $0x20] sm:$0xff]  ;;  %p152_p7 = scmp.lt.s32.totalorder %s521_s9, 1  ;;  %vm257_vm3 = vcmask 1040384   ;;  %vm259_vm4 = vcmask 1041408  }
  0x35   : > { %v385_v6 = vld [vmem:[%s130_s23 + $0x28] sm:$0xff]  ;;  %v194_v7 = vmax.f32 %v382_v2, %v383_v4  ;;  %v386_v9 = vld [vmem:[%s130_s23 + $0x30] sm:$0xff]  ;;  %v387_v13 = vld [vmem:[%s130_s23 + $0x38] sm:$0xff]  ;;  %vm261_vm5 = vcmask 1042432   ;;  %vm264_vm6 = vcmask 1044480   ;;  %vm266_vm7 = vcmask 1045504  }
  0x36   : > { %v222_v8 = vmax.f32 %v384_v5, %v385_v6  ;;  %v166_v10 = vmax.f32 %v163_v3, %v382_v2  ;;  %s702_s9 = smov (!%p152_p7, %s521_s9), 1  ;;  %vm268_vm8 = vcmask 1046528  }
  0x37   : > { %v197_v11 = vmax.f32 %v194_v7, %v384_v5  ;;  %s391_s17 = sshll.u32 %s702_s9, 4 }
  0x38   : > { %v225_v12 = vmax.f32 %v222_v8, %v386_v9  ;;  %v169_v14 = vmax.f32 %v166_v10, %v383_v4  ;;  %s159_s26 = scalar_lea.vmem %s690_s1, %s391_s17 }
  0x39   : > { %v200_v15 = vmax.f32 %v197_v11, %v385_v6 }
  0x3a   : > { %v171_v16 = vsel %vm170_vm0, %v169_v14, -inf  ;;  %v179_v17 = vsel %vm178_vm2, %v169_v14, -inf  ;;  %v187_v18 = vsel %vm186_vm1, %v169_v14, -inf  ;;  %v228_v19 = vmax.f32 %v225_v12, %v387_v13 }
  0x3b   : > { %v172_v20 = vrot.slane %v171_v16, 4  ;;  %v180_v21 = vrot.slane %v179_v17, 4  ;;  %v188_v22 = vrot.slane %v187_v18, 4  ;;  %v201_v23 = vsel %vm170_vm0, %v200_v15, -inf }
  0x3c   : > { %v202_v24 = vrot.slane %v201_v23, 4  ;;  %v208_v25 = vsel %vm178_vm2, %v200_v15, -inf  ;;  %v215_v26 = vsel %vm186_vm1, %v200_v15, -inf  ;;  %v229_v27 = vsel %vm170_vm0, %v228_v19, -inf }
  0x3d   : > { %v173_v28 = vmax.f32 %v171_v16, %v172_v20  ;;  %v181_v29 = vmax.f32 %v179_v17, %v180_v21  ;;  %v189_v30 = vmax.f32 %v187_v18, %v188_v22  ;;  %v209_v31 = vrot.slane %v208_v25, 4 }
  0x3e   : > { %v216_v32 = vrot.slane %v215_v26, 4  ;;  %v230_v33 = vrot.slane %v229_v27, 4  ;;  %v243_v34 = vsel %vm186_vm1, %v228_v19, -inf  ;;  %v250_v35 = vmax.f32 %v169_v14, %v228_v19 }
  0x3f   : > { %v174_v36 = vrot.slane %v173_v28, 2  ;;  %v182_v37 = vrot.slane %v181_v29, 2  ;;  %v190_v38 = vrot.slane %v189_v30, 2  ;;  %v210_v39 = vmax.f32 %v208_v25, %v209_v31 }
  0x40   : > { %v217_v40 = vmax.f32 %v215_v26, %v216_v32  ;;  %v231_v41 = vmax.f32 %v229_v27, %v230_v33  ;;  %v244_v42 = vrot.slane %v243_v34, 4  ;;  %v251_v43 = vrot.slane %v250_v35, 4 }
  0x41   : > { %v175_v44 = vmax.f32 %v173_v28, %v174_v36  ;;  %v191_v45 = vmax.f32 %v189_v30, %v190_v38  ;;  %v211_v46 = vrot.slane %v210_v39, 2  ;;  %v183_v47 = vmax.f32 %v181_v29, %v182_v37 }
  0x42   : > { %v232_v48 = vrot.slane %v231_v41, 2  ;;  %v245_v49 = vmax.f32 %v243_v34, %v244_v42  ;;  %v252_v50 = vmax.f32 %v250_v35, %v251_v43  ;;  %v218_v53 = vrot.slane %v217_v40, 2 }
  0x43   : > { %v176_v51 = vrot.slane %v175_v44, 1  ;;  %v192_v52 = vrot.slane %v191_v45, 1  ;;  %v203_v54 = vmax.f32 %v201_v23, %v202_v24  ;;  %v212_v58 = vmax.f32 %v210_v39, %v211_v46 }
  0x44   : > { %v233_v55 = vmax.f32 %v231_v41, %v232_v48  ;;  %v246_v56 = vrot.slane %v245_v49, 2  ;;  %v253_v57 = vrot.slane %v252_v50, 2  ;;  %v184_v0 = vrot.slane %v183_v47, 1 }
  0x45   : > { %v204_v59 = vrot.slane %v203_v54, 2  ;;  %v213_v63 = vrot.slane %v212_v58, 1  ;;  %v219_v2 = vmax.f32 %v217_v40, %v218_v53  ;;  %v236_v3 = vsel %vm178_vm2, %v228_v19, -inf }
  0x46   : > { %v234_v60 = vrot.slane %v233_v55, 1  ;;  %v247_v61 = vmax.f32 %v245_v49, %v246_v56  ;;  %v254_v62 = vmax.f32 %v252_v50, %v253_v57  ;;  %v177_v4 = vmax.f32 %v175_v44, %v176_v51 }
  0x47   : > { %v205_v1 = vmax.f32 %v203_v54, %v204_v59  ;;  %v193_v5 = vmax.f32 %v191_v45, %v192_v52  ;;  %v214_v9 = vmax.f32 %v212_v58, %v213_v63  ;;  %v220_v10 = vrot.slane %v219_v2, 1 }
  0x48   : > { %v248_v6 = vrot.slane %v247_v61, 1  ;;  %v255_v7 = vrot.slane %v254_v62, 1  ;;  %v237_v11 = vrot.slane %v236_v3, 4  ;;  %v235_v12 = vmax.f32 %v233_v55, %v234_v60 }
  0x49   : > { %v206_v8 = vrot.slane %v205_v1, 1  ;;  %v221_v16 = vmax.f32 %v219_v2, %v220_v10  ;;  %v185_v19 = vmax.f32 %v183_v47, %v184_v0 }
  0x4a   : > { %v256_v13 = vmax.f32 %v254_v62, %v255_v7  ;;  %v249_v14 = vmax.f32 %v247_v61, %v248_v6  ;;  %v238_v17 = vmax.f32 %v236_v3, %v237_v11 }
  0x4b   : > { %v207_v15 = vmax.f32 %v205_v1, %v206_v8 }
  0x4c   : > { %v258_v18 = vsel %vm257_vm3, %v256_v13, %v177_v4  ;;  %v239_v21 = vrot.slane %v238_v17, 2 }
  0x4d   : > { %v260_v20 = vsel %vm259_vm4, %v258_v18, %v193_v5  ;;  %v271_v22 = vsel %vm257_vm3, %v207_v15, %v214_v9 }
  0x4e   : > { %v262_v23 = vsel %vm261_vm5, %v260_v20, %v235_v12  ;;  %v240_v25 = vmax.f32 %v238_v17, %v239_v21  ;;  %v272_v26 = vsel %vm259_vm4, %v271_v22, %v221_v16 }
  0x4f   : > { %v263_v24 = vsel %vm170_vm0, %v262_v23, %v249_v14  ;;  %v273_v31 = vsel %vm261_vm5, %v272_v26, %v235_v12 }
  0x50   : > { %v265_v27 = vsel %vm264_vm6, %v263_v24, %v177_v4  ;;  %v241_v29 = vrot.slane %v240_v25, 1 }
  0x51   : > { %v267_v28 = vsel %vm266_vm7, %v265_v27, %v185_v19 }
  0x52   : > { %v269_v30 = vsel %vm268_vm8, %v267_v28, %v193_v5  ;;  %v242_v32 = vmax.f32 %v240_v25, %v241_v29 }
  0x53   : > { %270 = vst [vmem:[%s159_s26] sm:$0xff] %v269_v30 }
  0x54   : > { %v274_v33 = vsel %vm170_vm0, %v273_v31, %v242_v32 }
  0x55   : > { %v275_v34 = vsel %vm264_vm6, %v274_v33, %v249_v14 }
  0x56   : > { %v276_v35 = vsel %vm266_vm7, %v275_v34, 0.0 }
  0x57   : > { %v277_v36 = vsel %vm268_vm8, %v276_v35, 0.0 }
  0x58   : > { %278 = vst [vmem:[%s159_s26 + $0x8] sm:$0xff] %v277_v36 }
  0x59 PF: > { %s14_s11 = sadd.s32 1, %s529_s11   ;;  %s694_s6 = smov %s513_s7 }
  0x5a   : > { %p11_p9 = scmp.ge.s32.totalorder %s14_s11, 4   ;;  %s695_s7 = smov %s517_s8 }
  0x5b   : > { %s696_s8 = smov %s593_s18  ;;  %s697_s9 = smov %s525_s10 }
  0x5c   : > { %s698_s10 = smov %s700_s13  ;;  %13 = sbr.rel (!%p11_p9) target bundleno = 4 (0x4), region = 71 }
  0x63   :  { %306 = vsyncpa [#allocation3], 1 }
  0x64   :  { %308 = vsyncpa [#allocation3 + $0x1], 1 }

</bundles_post_ra>
